<compile_context>
chip_gen: v5e
topology: v5e:2x2
jax: 0.10.0
libtpu: 0.0.40
codegen_flags: <defaults>
</compile_context>

<pallas_src>
import functools

import jax
import jax.numpy as jnp
from jax.experimental import pallas as pl
from jax.experimental.pallas import tpu as pltpu

_LANES = 128
_MAX_BLOCK_ROWS = 2048  # (2048,128) f32 block = 1 MiB per pipeline buffer


def _round_up(a, b):
    return ((a + b - 1) // b) * b


def _dice_bce_kernel(x_ref, t_ref, out_ref,
                     acc_inter, acc_p, acc_t, acc_bce,
                     *, smooth, n_elems, block_rows):
    i = pl.program_id(0)

    @pl.when(i == 0)
    def _init():
        acc_inter[...] = jnp.zeros_like(acc_inter)
        acc_p[...] = jnp.zeros_like(acc_p)
        acc_t[...] = jnp.zeros_like(acc_t)
        acc_bce[...] = jnp.zeros_like(acc_bce)

    x = x_ref[...]                          # f32 logits
    t = t_ref[...].astype(jnp.float32)      # bf16 -> f32 (exact for 0/1)

    p = jax.nn.sigmoid(x)

    # binary_cross_entropy with PyTorch's log clamp at -100.
    log_p = jnp.maximum(jnp.log(p), jnp.float32(-100.0))
    log_1mp = jnp.maximum(jnp.log1p(-p), jnp.float32(-100.0))
    bce = -(t * log_p + (1.0 - t) * log_1mp)

    # Padding (x = -1e4, t = 0) contributes exactly 0 to every sum below:
    #   p == 0, p*t == 0, bce == -(0*(-100) + 1*log1p(-0)) == 0.
    r = block_rows // 8
    acc_inter[...] += (p * t).reshape(r, 8, _LANES).sum(axis=0)
    acc_p[...] += p.reshape(r, 8, _LANES).sum(axis=0)
    acc_t[...] += t.reshape(r, 8, _LANES).sum(axis=0)
    acc_bce[...] += bce.reshape(r, 8, _LANES).sum(axis=0)

    @pl.when(i == pl.num_programs(0) - 1)
    def _finalize():
        inter = jnp.sum(acc_inter[...])
        p_sum = jnp.sum(acc_p[...])
        t_sum = jnp.sum(acc_t[...])
        bce_sum = jnp.sum(acc_bce[...])
        dice_loss = 1.0 - (2.0 * inter + smooth) / (p_sum + t_sum + smooth)
        bce_mean = bce_sum / jnp.float32(n_elems)
        out_ref[0, 0] = bce_mean + dice_loss


def dice_bce_loss(inputs, targets, smooth=1.0):
    """Pallas TPU implementation of DiceBCELoss.forward (returns scalar f32)."""
    x = jnp.asarray(inputs, jnp.float32).reshape(-1)
    t = jnp.asarray(targets, jnp.bfloat16).reshape(-1)  # exact for 0/1 labels
    n = x.shape[0]

    rows_needed = -(-n // _LANES)
    # Multiple of 16 keeps both f32 (8,128) and bf16 (16,128) tile constraints.
    block_rows = min(_MAX_BLOCK_ROWS, _round_up(rows_needed, 16))
    rows_padded = _round_up(rows_needed, block_rows)
    n_pad = rows_padded * _LANES

    # Analytic padding: sigmoid(-1e4) == 0 exactly, target 0 -> zero
    # contribution to every accumulated quantity (no mask stream needed).
    x = jnp.pad(x, (0, n_pad - n), constant_values=-1e4)
    t = jnp.pad(t, (0, n_pad - n), constant_values=0)

    x2 = x.reshape(rows_padded, _LANES)
    t2 = t.reshape(rows_padded, _LANES)

    grid = (rows_padded // block_rows,)
    blk = pl.BlockSpec((block_rows, _LANES), lambda i: (i, 0))

    out = pl.pallas_call(
        functools.partial(
            _dice_bce_kernel,
            smooth=float(smooth),
            n_elems=int(n),
            block_rows=int(block_rows),
        ),
        out_shape=jax.ShapeDtypeStruct((1, 1), jnp.float32),
        grid_spec=pltpu.PrefetchScalarGridSpec(
            num_scalar_prefetch=0,
            grid=grid,
            in_specs=[blk, blk],
            out_specs=pl.BlockSpec(memory_space=pltpu.SMEM),
            scratch_shapes=[
                pltpu.VMEM((8, _LANES), jnp.float32),  # intersection
                pltpu.VMEM((8, _LANES), jnp.float32),  # sum(p)
                pltpu.VMEM((8, _LANES), jnp.float32),  # sum(t)
                pltpu.VMEM((8, _LANES), jnp.float32),  # sum(bce)
            ],
        ),
        compiler_params=pltpu.CompilerParams(
            dimension_semantics=("arbitrary",),
        ),
    )(x2, t2)
    return out[0, 0]


def _reference(inputs, targets, smooth=1.0):
    p = jax.nn.sigmoid(jnp.asarray(inputs, jnp.float32)).reshape(-1)
    t = jnp.asarray(targets, jnp.float32).reshape(-1)
    intersection = jnp.sum(p * t)
    dice = 1.0 - (2.0 * intersection + smooth) / (jnp.sum(p) + jnp.sum(t) + smooth)
    log_p = jnp.maximum(jnp.log(p), -100.0)
    log_1mp = jnp.maximum(jnp.log1p(-p), -100.0)
    bce = jnp.mean(-(t * log_p + (1.0 - t) * log_1mp))
    return bce + dice


if __name__ == "__main__":
    key = jax.random.PRNGKey(0)
    k1, k2 = jax.random.split(key)
    # NCHW-shaped logits and binary targets, small shapes.
    x = jax.random.normal(k1, (2, 4, 16, 16), dtype=jnp.float32)
    t = (jax.random.uniform(k2, (2, 4, 16, 16)) > 0.5).astype(jnp.float32)

    loss = dice_bce_loss(x, t, smooth=1.0)
    loss = jax.block_until_ready(loss)

    ref = _reference(x, t, smooth=1.0)
    assert jnp.allclose(loss, ref, rtol=1e-5, atol=1e-5), (loss, ref)

    print("KERNEL_OK")
</pallas_src>

<mosaic_0001>
module attributes {stable_mosaic.version = 11 : i64} {
  func.func @_dice_bce_kernel(%arg0: i32, %arg1: memref<16x128xf32, #tpu.memory_space<vmem>>, %arg2: memref<16x128xbf16, #tpu.memory_space<vmem>>, %arg3: memref<1x1xf32, #tpu.memory_space<smem>>, %arg4: memref<8x128xf32, #tpu.memory_space<vmem>>, %arg5: memref<8x128xf32, #tpu.memory_space<vmem>>, %arg6: memref<8x128xf32, #tpu.memory_space<vmem>>, %arg7: memref<8x128xf32, #tpu.memory_space<vmem>>) attributes {dimension_semantics = [#tpu.dimension_semantics<arbitrary>], iteration_bounds = array<i64: 1>, scalar_prefetch = 0 : i64, scratch_operands = 4 : i64, tpu.core_type = #tpu.core_type<tc>, window_params = [{transform_indices = @transform_0, window_bounds = array<i64: 16, 128>}, {transform_indices = @transform_1, window_bounds = array<i64: 16, 128>}, {transform_indices = @transform_2, window_bounds = array<i64: 1, 1>}]} {
    %c0_i32 = arith.constant 0 : i32
    %0 = arith.cmpi eq, %arg0, %c0_i32 : i32
    %1 = arith.extui %0 : i1 to i32
    %c0_i32_0 = arith.constant 0 : i32
    %2 = arith.cmpi ne, %1, %c0_i32_0 : i32
    scf.if %2 {
      %cst_31 = arith.constant 0.000000e+00 : f32
      %50 = vector.broadcast %cst_31 : f32 to vector<8x128xf32>
      %c0_32 = arith.constant 0 : index
      %c0_33 = arith.constant 0 : index
      %51 = vector.load %arg4[%c0_32, %c0_33] : memref<8x128xf32, #tpu.memory_space<vmem>>, vector<8x128xf32>
      tpu.vector_store %arg4[%c0_32, %c0_33], %50 {strides = array<i32>} : memref<8x128xf32, #tpu.memory_space<vmem>>, vector<8x128xf32>,
      %cst_34 = arith.constant 0.000000e+00 : f32
      %52 = vector.broadcast %cst_34 : f32 to vector<8x128xf32>
      %c0_35 = arith.constant 0 : index
      %c0_36 = arith.constant 0 : index
      %53 = vector.load %arg5[%c0_35, %c0_36] : memref<8x128xf32, #tpu.memory_space<vmem>>, vector<8x128xf32>
      tpu.vector_store %arg5[%c0_35, %c0_36], %52 {strides = array<i32>} : memref<8x128xf32, #tpu.memory_space<vmem>>, vector<8x128xf32>,
      %cst_37 = arith.constant 0.000000e+00 : f32
      %54 = vector.broadcast %cst_37 : f32 to vector<8x128xf32>
      %c0_38 = arith.constant 0 : index
      %c0_39 = arith.constant 0 : index
      %55 = vector.load %arg6[%c0_38, %c0_39] : memref<8x128xf32, #tpu.memory_space<vmem>>, vector<8x128xf32>
      tpu.vector_store %arg6[%c0_38, %c0_39], %54 {strides = array<i32>} : memref<8x128xf32, #tpu.memory_space<vmem>>, vector<8x128xf32>,
      %cst_40 = arith.constant 0.000000e+00 : f32
      %56 = vector.broadcast %cst_40 : f32 to vector<8x128xf32>
      %c0_41 = arith.constant 0 : index
      %c0_42 = arith.constant 0 : index
      %57 = vector.load %arg7[%c0_41, %c0_42] : memref<8x128xf32, #tpu.memory_space<vmem>>, vector<8x128xf32>
      tpu.vector_store %arg7[%c0_41, %c0_42], %56 {strides = array<i32>} : memref<8x128xf32, #tpu.memory_space<vmem>>, vector<8x128xf32>,
    } else {
    }
    %c0 = arith.constant 0 : index
    %c0_1 = arith.constant 0 : index
    %3 = vector.load %arg1[%c0, %c0_1] : memref<16x128xf32, #tpu.memory_space<vmem>>, vector<16x128xf32>
    %c0_2 = arith.constant 0 : index
    %c0_3 = arith.constant 0 : index
    %4 = vector.load %arg2[%c0_2, %c0_3] : memref<16x128xbf16, #tpu.memory_space<vmem>>, vector<16x128xbf16>
    %5 = arith.extf %4 : vector<16x128xbf16> to vector<16x128xf32>
    %6 = arith.negf %3 : vector<16x128xf32>
    %7 = math.exp %6 : vector<16x128xf32>
    %cst = arith.constant 1.000000e+00 : f32
    %8 = vector.broadcast %cst : f32 to vector<16x128xf32>
    %9 = arith.addf %8, %7 : vector<16x128xf32>
    %10 = arith.divf %8, %9 : vector<16x128xf32>
    %11 = math.log %10 : vector<16x128xf32>
    %cst_4 = arith.constant -1.000000e+02 : f32
    %12 = vector.broadcast %cst_4 : f32 to vector<16x128xf32>
    %13 = arith.maximumf %11, %12 : vector<16x128xf32>
    %cst_5 = arith.constant 0.000000e+00 : f32
    %14 = vector.broadcast %cst_5 : f32 to vector<16x128xf32>
    %15 = arith.subf %14, %10 : vector<16x128xf32>
    %16 = math.log1p %15 : vector<16x128xf32>
    %cst_6 = arith.constant -1.000000e+02 : f32
    %17 = vector.broadcast %cst_6 : f32 to vector<16x128xf32>
    %18 = arith.maximumf %16, %17 : vector<16x128xf32>
    %19 = arith.mulf %5, %13 : vector<16x128xf32>
    %cst_7 = arith.constant 1.000000e+00 : f32
    %20 = vector.broadcast %cst_7 : f32 to vector<16x128xf32>
    %21 = arith.subf %20, %5 : vector<16x128xf32>
    %22 = arith.mulf %21, %18 : vector<16x128xf32>
    %23 = arith.addf %19, %22 : vector<16x128xf32>
    %cst_8 = arith.constant 0.000000e+00 : f32
    %24 = vector.broadcast %cst_8 : f32 to vector<16x128xf32>
    %25 = arith.subf %24, %23 : vector<16x128xf32>
    %c0_9 = arith.constant 0 : index
    %c0_10 = arith.constant 0 : index
    %26 = vector.load %arg4[%c0_9, %c0_10] : memref<8x128xf32, #tpu.memory_space<vmem>>, vector<8x128xf32>
    %27 = arith.mulf %10, %5 : vector<16x128xf32>
    %28 = vector.shape_cast %27 : vector<16x128xf32> to vector<2x8x128xf32>
    %cst_11 = arith.constant dense<0.000000e+00> : vector<8x128xf32>
    %29 = vector.multi_reduction <add>, %28, %cst_11 [0] : vector<2x8x128xf32> to vector<8x128xf32>
    %30 = arith.addf %26, %29 : vector<8x128xf32>
    %c0_12 = arith.constant 0 : index
    %c0_13 = arith.constant 0 : index
    %31 = vector.load %arg4[%c0_12, %c0_13] : memref<8x128xf32, #tpu.memory_space<vmem>>, vector<8x128xf32>
    tpu.vector_store %arg4[%c0_12, %c0_13], %30 {strides = array<i32>} : memref<8x128xf32, #tpu.memory_space<vmem>>, vector<8x128xf32>,
    %c0_14 = arith.constant 0 : index
    %c0_15 = arith.constant 0 : index
    %32 = vector.load %arg5[%c0_14, %c0_15] : memref<8x128xf32, #tpu.memory_space<vmem>>, vector<8x128xf32>
    %33 = vector.shape_cast %10 : vector<16x128xf32> to vector<2x8x128xf32>
    %cst_16 = arith.constant dense<0.000000e+00> : vector<8x128xf32>
    %34 = vector.multi_reduction <add>, %33, %cst_16 [0] : vector<2x8x128xf32> to vector<8x128xf32>
    %35 = arith.addf %32, %34 : vector<8x128xf32>
    %c0_17 = arith.constant 0 : index
    %c0_18 = arith.constant 0 : index
    %36 = vector.load %arg5[%c0_17, %c0_18] : memref<8x128xf32, #tpu.memory_space<vmem>>, vector<8x128xf32>
    tpu.vector_store %arg5[%c0_17, %c0_18], %35 {strides = array<i32>} : memref<8x128xf32, #tpu.memory_space<vmem>>, vector<8x128xf32>,
    %c0_19 = arith.constant 0 : index
    %c0_20 = arith.constant 0 : index
    %37 = vector.load %arg6[%c0_19, %c0_20] : memref<8x128xf32, #tpu.memory_space<vmem>>, vector<8x128xf32>
    %38 = vector.shape_cast %5 : vector<16x128xf32> to vector<2x8x128xf32>
    %cst_21 = arith.constant dense<0.000000e+00> : vector<8x128xf32>
    %39 = vector.multi_reduction <add>, %38, %cst_21 [0] : vector<2x8x128xf32> to vector<8x128xf32>
    %40 = arith.addf %37, %39 : vector<8x128xf32>
    %c0_22 = arith.constant 0 : index
    %c0_23 = arith.constant 0 : index
    %41 = vector.load %arg6[%c0_22, %c0_23] : memref<8x128xf32, #tpu.memory_space<vmem>>, vector<8x128xf32>
    tpu.vector_store %arg6[%c0_22, %c0_23], %40 {strides = array<i32>} : memref<8x128xf32, #tpu.memory_space<vmem>>, vector<8x128xf32>,
    %c0_24 = arith.constant 0 : index
    %c0_25 = arith.constant 0 : index
    %42 = vector.load %arg7[%c0_24, %c0_25] : memref<8x128xf32, #tpu.memory_space<vmem>>, vector<8x128xf32>
    %43 = vector.shape_cast %25 : vector<16x128xf32> to vector<2x8x128xf32>
    %cst_26 = arith.constant dense<0.000000e+00> : vector<8x128xf32>
    %44 = vector.multi_reduction <add>, %43, %cst_26 [0] : vector<2x8x128xf32> to vector<8x128xf32>
    %45 = arith.addf %42, %44 : vector<8x128xf32>
    %c0_27 = arith.constant 0 : index
    %c0_28 = arith.constant 0 : index
    %46 = vector.load %arg7[%c0_27, %c0_28] : memref<8x128xf32, #tpu.memory_space<vmem>>, vector<8x128xf32>
    tpu.vector_store %arg7[%c0_27, %c0_28], %45 {strides = array<i32>} : memref<8x128xf32, #tpu.memory_space<vmem>>, vector<8x128xf32>,
    %c0_i32_29 = arith.constant 0 : i32
    %47 = arith.cmpi eq, %arg0, %c0_i32_29 : i32
    %48 = arith.extui %47 : i1 to i32
    %c0_i32_30 = arith.constant 0 : i32
    %49 = arith.cmpi ne, %48, %c0_i32_30 : i32
    scf.if %49 {
      %c0_31 = arith.constant 0 : index
      %c0_32 = arith.constant 0 : index
      %50 = vector.load %arg4[%c0_31, %c0_32] : memref<8x128xf32, #tpu.memory_space<vmem>>, vector<8x128xf32>
      %51 = vector.shape_cast %50 : vector<8x128xf32> to vector<1x8x128xf32>
      %cst_33 = arith.constant dense<0.000000e+00> : vector<1xf32>
      %52 = vector.multi_reduction <add>, %51, %cst_33 [1, 2] : vector<1x8x128xf32> to vector<1xf32>
      %53 = vector.shape_cast %52 : vector<1xf32> to vector<1x1x1xf32>
      %54 = vector.extract %53[0, 0, 0] : f32 from vector<1x1x1xf32>
      %c0_34 = arith.constant 0 : index
      %c0_35 = arith.constant 0 : index
      %55 = vector.load %arg5[%c0_34, %c0_35] : memref<8x128xf32, #tpu.memory_space<vmem>>, vector<8x128xf32>
      %56 = vector.shape_cast %55 : vector<8x128xf32> to vector<1x8x128xf32>
      %cst_36 = arith.constant dense<0.000000e+00> : vector<1xf32>
      %57 = vector.multi_reduction <add>, %56, %cst_36 [1, 2] : vector<1x8x128xf32> to vector<1xf32>
      %58 = vector.shape_cast %57 : vector<1xf32> to vector<1x1x1xf32>
      %59 = vector.extract %58[0, 0, 0] : f32 from vector<1x1x1xf32>
      %c0_37 = arith.constant 0 : index
      %c0_38 = arith.constant 0 : index
      %60 = vector.load %arg6[%c0_37, %c0_38] : memref<8x128xf32, #tpu.memory_space<vmem>>, vector<8x128xf32>
      %61 = vector.shape_cast %60 : vector<8x128xf32> to vector<1x8x128xf32>
      %cst_39 = arith.constant dense<0.000000e+00> : vector<1xf32>
      %62 = vector.multi_reduction <add>, %61, %cst_39 [1, 2] : vector<1x8x128xf32> to vector<1xf32>
      %63 = vector.shape_cast %62 : vector<1xf32> to vector<1x1x1xf32>
      %64 = vector.extract %63[0, 0, 0] : f32 from vector<1x1x1xf32>
      %c0_40 = arith.constant 0 : index
      %c0_41 = arith.constant 0 : index
      %65 = vector.load %arg7[%c0_40, %c0_41] : memref<8x128xf32, #tpu.memory_space<vmem>>, vector<8x128xf32>
      %66 = vector.shape_cast %65 : vector<8x128xf32> to vector<1x8x128xf32>
      %cst_42 = arith.constant dense<0.000000e+00> : vector<1xf32>
      %67 = vector.multi_reduction <add>, %66, %cst_42 [1, 2] : vector<1x8x128xf32> to vector<1xf32>
      %68 = vector.shape_cast %67 : vector<1xf32> to vector<1x1x1xf32>
      %69 = vector.extract %68[0, 0, 0] : f32 from vector<1x1x1xf32>
      %cst_43 = arith.constant 2.000000e+00 : f32
      %70 = arith.mulf %cst_43, %54 : f32
      %cst_44 = arith.constant 1.000000e+00 : f32
      %71 = arith.addf %70, %cst_44 : f32
      %72 = arith.addf %59, %64 : f32
      %cst_45 = arith.constant 1.000000e+00 : f32
      %73 = arith.addf %72, %cst_45 : f32
      %74 = arith.divf %71, %73 : f32
      %cst_46 = arith.constant 1.000000e+00 : f32
      %75 = arith.subf %cst_46, %74 : f32
      %cst_47 = arith.constant 2.048000e+03 : f32
      %76 = arith.divf %69, %cst_47 : f32
      %77 = arith.addf %76, %75 : f32
      %c0_48 = arith.constant 0 : index
      %c0_49 = arith.constant 0 : index
      %78 = memref.load %arg3[%c0_48, %c0_49] : memref<1x1xf32, #tpu.memory_space<smem>>
      memref.store %77, %arg3[%c0_48, %c0_49] : memref<1x1xf32, #tpu.memory_space<smem>>
    } else {
    }
    return
  }
  func.func @transform_0(%arg0: i32) -> (i32, i32) {
    %c0_i32 = arith.constant 0 : i32
    %c0_i32_0 = arith.constant 0 : i32
    return %arg0, %c0_i32 : i32, i32
  }
  func.func @transform_1(%arg0: i32) -> (i32, i32) {
    %c0_i32 = arith.constant 0 : i32
    %c0_i32_0 = arith.constant 0 : i32
    return %arg0, %c0_i32 : i32, i32
  }
  func.func @transform_2(%arg0: i32) -> (i32, i32) {
    %c0_i32 = arith.constant 0 : i32
    %c0_i32_0 = arith.constant 0 : i32
    %c0_i32_1 = arith.constant 0 : i32
    return %c0_i32, %c0_i32_0 : i32, i32
  }
}

</mosaic_0001>

<bundles_post_ra>
// kernel: tpu_custom_call.1
= control target key start
LH: loop header
LB: loop body
LE: loop exit
PB: predicated region body
PF: predicated region fallthrough
CT: control target
= control target key end

     0   :  { %7 = vsyncpa [#allocation7], 0  ;;  %s405_s0 = inlined_call_operand.hbm [shape: f32[16,128], index: 0, kind: input, shape index: {}]   ;;  %s406_s1 = inlined_call_operand.hbm [shape: bf16[16,128], index: 1, kind: input, shape index: {}]   ;;  %s407_s2 = inlined_call_operand.hbm [shape: f32[1,1], index: 2, kind: output, shape index: {}]  }
   0x1   :  { %8 = vsyncpa [#allocation10], 0 }
   0x2   :  { %9 = vsyncpa [#allocation8], 0  ;;  %s14_s11 = sshll.u32 %s405_s0, 4  ;;  %s358_s12 = smov [#allocation6]   ;;  %s15_s11 = int_to_ptr.hbm [resolvable:$true] %s14_s11 }
   0x3   :  { %s16_s13 = sshll.u32 %s358_s12, 4  ;;  %s27_s16 = sshll.u32 %s406_s1, 4  ;;  %s17_s13 = int_to_ptr.vmem [resolvable:$true] %s16_s13  ;;  %s28_s16 = int_to_ptr.hbm [resolvable:$true] %s27_s16 }
   0x4   :  { %s359_s17 = smov 128   ;;  %s360_s18 = smov 8  }
   0x5   :  { %22 = dma.hbm_to_vmem [thread:$0]  %s15_s11, 256, %s17_s13, [#allocation7], %s359_s17, %s359_s17, %s360_s18  }
   0x6   :  { %s361_s19 = smov [#allocation9]   ;;  %s362_s21 = smov 64  }
   0x7   :  { %s29_s20 = sshll.u32 %s361_s19, 4  ;;  %s363_s22 = smov 4   ;;  %s30_s20 = int_to_ptr.vmem [resolvable:$true] %s29_s20 }
   0x8   :  { %35 = dma.hbm_to_vmem [thread:$0]  %s28_s16, 128, %s30_s20, [#allocation10], %s362_s21, %s362_s21, %s363_s22  }
   0x9   :  { %352 = dma.done.wait [#allocation7], 256  }
   0xa   :  { %353 = vsyncadd [#allocation7], 4294967040 }
   0xb   :  { %354 = dma.done.wait [#allocation10], 128  }
   0xc   :  { %355 = vsyncadd [#allocation10], 4294967168  ;;  %v52_v0 = vld [vmem:[#allocation6] sm:$0xff]  ;;  %v53_v1 = vld [vmem:[#allocation6 + $0x8] sm:$0xff]  ;;  %s234_s6 = sshll.u32 %s407_s2, 4  ;;  %s365_s10 = smov [#allocation11]   ;;  %s235_s6 = int_to_ptr.hbm [resolvable:$true] %s234_s6 }
   0xd   :  { %v249_v2 = vld [vmem:[#allocation9] sm:$0xff]   ;;  %v246_v5 = vmul.f32 -1.442695, %v52_v0  ;;  %v247_v6 = vmul.f32 -1.442695, %v53_v1 }
   0xe   :  { %v387_v3 = vunpack.c.l.bf16 %v249_v2  ;;  %v389_v4 = vunpack.c.h.bf16 %v249_v2 }
   0xf   :  { %272 = vpow2.f32 %v246_v5 }
  0x10   :  { %v145_v7 = vadd.f32 %v389_v4, %v387_v3  ;;  %274 = vpow2.f32 %v247_v6  ;;  %v126_v58 = vsub.f32 1.0, %v387_v3  ;;  %v127_v60 = vsub.f32 1.0, %v389_v4 }
  0x12   :  { %176 = vadd.xlane.f32.xlu1 %v145_v7 }
  0x15   :  { %v273_v8 = vpop.eup %272 }
  0x16   :  { %v275_v9 = vpop.eup %274  ;;  %v64_v10 = vadd.f32 1.0, %v273_v8 }
  0x17   :  { %v65_v11 = vadd.f32 1.0, %v275_v9 }
  0x18   :  { %276 = vrcp.f32 %v64_v10  ;;  %vm71_vm0 = vweird.f32 %v64_v10  ;;  %v77_v15 = vand.u32 2147483648, %v64_v10  ;;  %v75_v18 = vand.u32 2147483647, %v64_v10 }
  0x19   :  { %278 = vrcp.f32 %v65_v11  ;;  %v92_v19 = vand.u32 2147483648, %v65_v11  ;;  %vm86_vm2 = vweird.f32 %v65_v11  ;;  %v90_v21 = vand.u32 2147483647, %v65_v11 }
  0x1a   :  { %v78_v23 = vor.u32 1.1754944e-38, %v77_v15  ;;  %vm76_vm5 = vcmp.eq.f32.partialorder %v75_v18, 8.507059e+37 }
  0x1b   :  { %v93_v26 = vor.u32 1.1754944e-38, %v92_v19  ;;  %vm91_vm7 = vcmp.eq.f32.partialorder %v90_v21, 8.507059e+37 }
  0x1e   :  { %v277_v12 = vpop.eup %276 }
  0x1f   :  { %v279_v13 = vpop.eup %278  ;;  %v67_v14 = vmul.f32 %v277_v12, %v64_v10  ;;  %vm72_vm1 = vweird.f32 %v277_v12 }
  0x20   :  { %v82_v16 = vmul.f32 %v279_v13, %v65_v11  ;;  %vm87_vm3 = vweird.f32 %v279_v13  ;;  %vm73_vm4 = vmor %vm71_vm0, %vm72_vm1 }
  0x21   :  { %v68_v17 = vsub.f32 1.0, %v67_v14  ;;  %vm88_vm6 = vmor %vm86_vm2, %vm87_vm3 }
  0x22   :  { %v83_v20 = vsub.f32 1.0, %v82_v16 }
  0x23   :  { %v69_v22 = vmul.f32 %v277_v12, %v68_v17 }
  0x24   :  { %v84_v24 = vmul.f32 %v279_v13, %v83_v20 }
  0x25   :  { %v70_v25 = vadd.f32 %v277_v12, %v69_v22 }
  0x26   :  { %v85_v27 = vadd.f32 %v279_v13, %v84_v24 }
  0x27   :  { %v74_v28 = vsel %vm73_vm4, %v277_v12, %v70_v25 }
  0x28   :  { %v79_v29 = vsel %vm76_vm5, %v78_v23, %v74_v28  ;;  %v89_v30 = vsel %vm88_vm6, %v279_v13, %v85_v27 }
  0x29   :  { %v94_v31 = vsel %vm91_vm7, %v93_v26, %v89_v30  ;;  %v135_v32 = vmul.f32 %v387_v3, %v79_v29  ;;  %280 = vlog2.f32 %v79_v29  ;;  %v102_v33 = vsub.f32 0.0, %v79_v29 }
  0x2a   :  { %282 = vlog2.f32 %v94_v31  ;;  %v103_v34 = vsub.f32 0.0, %v94_v31  ;;  %v136_v35 = vmul.f32 %v389_v4, %v94_v31  ;;  %v141_v49 = vadd.f32 %v94_v31, %v79_v29 }
  0x2b   :  { %v104_v36 = vadd.f32 1.0, %v102_v33  ;;  %v107_v37 = vmul.f32 -0.5, %v102_v33  ;;  %v110_v43 = vand.u32 2147483647, %v102_v33 }
  0x2c   :  { %v137_v38 = vadd.f32 %v136_v35, %v135_v32  ;;  %v113_v39 = vadd.f32 1.0, %v103_v34  ;;  %v116_v40 = vmul.f32 -0.5, %v103_v34  ;;  %v119_v47 = vand.u32 2147483647, %v103_v34 }
  0x2d   :  { %284 = vlog2.f32 %v104_v36  ;;  %v108_v41 = vadd.f32 1.0, %v107_v37  ;;  %vm111_vm8 = vcmp.lt.f32.partialorder %v110_v43, 0.0004427343  ;;  %v364_v37 = vmov 2048.0  }
  0x2e   :  { %156 = vadd.xlane.f32.xlu0 %v137_v38  ;;  %286 = vlog2.f32 %v113_v39  ;;  %v117_v44 = vadd.f32 1.0, %v116_v40  ;;  %vm120_vm9 = vcmp.lt.f32.partialorder %v119_v47, 0.0004427343 }
  0x2f   :  { %v281_v42 = vpop.eup %280  ;;  %v109_v50 = vmul.f32 %v108_v41, %v102_v33  ;;  %288 = vrcp.f32 %v364_v37 }
  0x30   :  { %v283_v45 = vpop.eup %282  ;;  %v97_v46 = vmul.f32 0.6931472, %v281_v42  ;;  %v118_v53 = vmul.f32 %v117_v44, %v103_v34 }
  0x31   :  { %v99_v48 = vmul.f32 0.6931472, %v283_v45 }
  0x32   :  { %v100_v52 = vmax.f32 %v97_v46, -100.0 }
  0x33   :  { %v285_v51 = vpop.eup %284  ;;  %v101_v55 = vmax.f32 %v99_v48, -100.0 }
  0x34   :  { %v287_v54 = vpop.eup %286  ;;  %v106_v56 = vmul.f32 0.6931472, %v285_v51  ;;  %v124_v63 = vmul.f32 %v387_v3, %v100_v52 }
  0x35   :  { %v115_v57 = vmul.f32 0.6931472, %v287_v54  ;;  %v125_v1 = vmul.f32 %v389_v4, %v101_v55  ;;  %v289_v38 = vpop.eup %288 }
  0x36   :  { %166 = vadd.xlane.f32.xlu0 %v141_v49  ;;  %v112_v59 = vsel %vm111_vm8, %v109_v50, %v106_v56  ;;  %v218_v40 = vmul.f32 2048.0, %v289_v38  ;;  %vm222_vm11 = vweird.f32 %v289_v38 }
  0x37   :  { %v121_v61 = vsel %vm120_vm9, %v118_v53, %v115_v57  ;;  %v122_v62 = vmax.f32 %v112_v59, -100.0 }
  0x38   :  { %v123_v0 = vmax.f32 %v121_v61, -100.0  ;;  %v219_v41 = vsub.f32 1.0, %v218_v40 }
  0x39   :  { %v128_v2 = vmul.f32 %v126_v58, %v122_v62 }
  0x3a   :  { %v129_v5 = vmul.f32 %v127_v60, %v123_v0  ;;  %v220_v44 = vmul.f32 %v289_v38, %v219_v41 }
  0x3b   :  { %v130_v6 = vadd.f32 %v128_v2, %v124_v63 }
  0x3c   :  { %v131_v7 = vadd.f32 %v129_v5, %v125_v1  ;;  %v221_v49 = vadd.f32 %v289_v38, %v220_v44 }
  0x3d   :  { %v132_v8 = vsub.f32 0.0, %v130_v6 }
  0x3e   :  { %v133_v9 = vsub.f32 0.0, %v131_v7  ;;  %v223_v53 = vsel %vm222_vm11, %v289_v38, %v221_v49 }
  0x40   :  { %v149_v10 = vadd.f32 %v133_v9, %v132_v8 }
  0x42   :  { %186 = vadd.xlane.f32.xlu1 %v149_v10 }
  0x85   :  { %v177_v11 = vpop.xlane.xlu1 %176 }
  0x86   :  { %v178_v13 = vrot.slane %v177_v11, 4 }
  0x88   :  { %v179_v16 = vadd.f32 %v178_v13, %v177_v11 }
  0x8a   :  { %v180_v3 = vrot.slane %v179_v16, 2 }
  0x8c   :  { %v181_v23 = vadd.f32 %v180_v3, %v179_v16 }
  0x8e   :  { %v182_v26 = vrot.slane %v181_v23, 1 }
  0x90   :  { %v183_v29 = vadd.f32 %v182_v26, %v181_v23 }
  0xa1   :  { %v157_v12 = vpop.xlane.xlu0 %156 }
  0xa2   :  { %v158_v14 = vrot.slane %v157_v12, 4 }
  0xa4   :  { %v159_v15 = vadd.f32 %v158_v14, %v157_v12 }
  0xa6   :  { %v160_v17 = vrot.slane %v159_v15, 2 }
  0xa8   :  { %v161_v18 = vadd.f32 %v160_v17, %v159_v15 }
  0xa9   :  { %v167_v19 = vpop.xlane.xlu0 %166 }
  0xaa   :  { %v168_v20 = vrot.slane %v167_v19, 4  ;;  %v162_v4 = vrot.slane %v161_v18, 1 }
  0xac   :  { %v169_v21 = vadd.f32 %v168_v20, %v167_v19  ;;  %v163_v22 = vadd.f32 %v162_v4, %v161_v18 }
  0xae   :  { %v170_v24 = vrot.slane %v169_v21, 2  ;;  %252 = vpush %v163_v22 }
  0xb0   :  { %v171_v25 = vadd.f32 %v170_v24, %v169_v21 }
  0xb2   :  { %v172_v27 = vrot.slane %v171_v25, 1 }
  0xb4   :  { %v173_v28 = vadd.f32 %v172_v27, %v171_v25 }
  0xb5   :  { %v187_v30 = vpop.xlane.xlu1 %186 }
  0xb6   :  { %254 = vpush %v173_v28  ;;  %v188_v31 = vrot.slane %v187_v30, 4 }
  0xb7   :  { %256 = vpush %v183_v29 }
  0xb8   :  { %v189_v32 = vadd.f32 %v188_v31, %v187_v30 }
  0xba   :  { %v190_v33 = vrot.slane %v189_v32, 2 }
  0xbc   :  { %v191_v34 = vadd.f32 %v190_v33, %v189_v32 }
  0xbe   :  { %v192_v35 = vrot.slane %v191_v34, 1 }
  0xc0   :  { %v193_v36 = vadd.f32 %v192_v35, %v191_v34 }
  0xc2   :  { %258 = vpush %v193_v36 }
  0xdf   :  { %s399_s0 = spop %252 }
  0xe0   :  { %s195_s26 = smul.f32 2.0, %s399_s0 }
  0xe2   :  { %s196_s27 = sadd.f32 1.0, %s195_s26 }
  0xe7   :  { %s255_s1 = spop %254 }
  0xe8   :  { %s257_s23 = spop %256 }
  0xe9   :  { %s197_s24 = sadd.f32 %s257_s23, %s255_s1 }
  0xeb   :  { %s198_s25 = sadd.f32 1.0, %s197_s24 }
  0xed   :  { %v199_v39 = vstv %s198_s25 }
  0xee   :  { %290 = vrcp.f32 %v199_v39  ;;  %v211_v46 = vand.u32 2147483648, %v199_v39  ;;  %v209_v48 = vand.u32 2147483647, %v199_v39  ;;  %vm205_vm12 = vweird.f32 %v199_v39 }
  0xf0   :  { %v212_v51 = vor.u32 1.1754944e-38, %v211_v46  ;;  %vm210_vm14 = vcmp.eq.f32.partialorder %v209_v48, 8.507059e+37 }
  0xf3   :  { %s259_s28 = spop %258 }
  0xf4   :  { %v291_v42 = vpop.eup %290 }
  0xf5   :  { %v201_v43 = vmul.f32 %v291_v42, %v199_v39  ;;  %vm206_vm10 = vweird.f32 %v291_v42 }
  0xf6   :  { %vm207_vm13 = vmor %vm205_vm12, %vm206_vm10 }
  0xf7   :  { %v202_v45 = vsub.f32 1.0, %v201_v43 }
  0xf9   :  { %v203_v47 = vmul.f32 %v291_v42, %v202_v45 }
  0xfb   :  { %v204_v50 = vadd.f32 %v291_v42, %v203_v47 }
  0xfd   :  { %v208_v52 = vsel %vm207_vm13, %v291_v42, %v204_v50 }
  0xfe   :  { %v213_v54 = vsel %vm210_vm14, %v212_v51, %v208_v52 }
  0xff   :  { %260 = vpush %v213_v54 }
 0x100   :  { %262 = vpush %v223_v53 }
 0x130   :  { %s261_s29 = spop %260 }
 0x131   :  { %s215_s30 = smul.f32 %s261_s29, %s196_s27  ;;  %s263_s3 = spop %262 }
 0x132   :  { %s225_s8 = smul.f32 %s263_s3, %s259_s28 }
 0x133   :  { %s216_s7 = ssub.f32 1.0, %s215_s30 }
 0x135   :  { %s226_s9 = sadd.f32 %s225_s8, %s216_s7 }
 0x137   :  { %228 = sst [smem:[#allocation11]] %s226_s9 }
 0x138   :  { %237 = dma.smem_to_hbm %s365_s10, 16, %s235_s6, [#allocation8]  }
 0x139   :  { %356 = dma.done.wait [#allocation8], 16  }
 0x13a   :  { %357 = vsyncadd [#allocation8], 4294967280 }
 0x13b   :  { %242 = sfence }
 0x13c   :  { %243 = vsyncpa [#allocation7], 1 }
 0x13d   :  { %244 = vsyncpa [#allocation10], 1 }
 0x13e   :  { %245 = vsyncpa [#allocation8], 1 }

</bundles_post_ra>
